<compile_context>
chip_gen: v6e
topology: v6e:2x2x1
jax: 0.10.0
libtpu: 0.0.40
codegen_flags: <defaults>
</compile_context>

<pallas_src>
import functools

import jax
import jax.numpy as jnp
from jax import lax
from jax.experimental import pallas as pl
from jax.experimental.pallas import tpu as pltpu

LRELU_SLOPE = 0.1
LANE = 128                       # channel axis padded to multiples of this
TM_TARGET = 512                  # time-tile rows (multiple of 16)
VMEM_LIMIT = 48 * 1024 * 1024    # explicit budget; fits v7x's 64 MiB VMEM


def get_padding(kernel_size, dilation=1):
    return (kernel_size * dilation - dilation) // 2


def _round_up(n, m):
    return (n + m - 1) // m * m


# ----------------------------------------------------------------------------
# Fused conv kernel (one time tile per grid step)
# ----------------------------------------------------------------------------
def _conv_kernel(x_ref, xh_ref, w_ref, b_ref, *rest, K, dilation, tm,
                 n_adds, pre_slope, pre_scale, post_tanh):
    """x_ref : (TM, Cin_pad)          current (already padded) time tile
       xh_ref: (HALO_PAD, Cin_pad)    halo rows following the tile
       w_ref : (K*Cin_pad, Cout_pad)  im2col-folded weights
       b_ref : (1, Cout_pad)          f32 bias
       rest  : n_adds fused-add inputs (TM, Cout_pad) + the output ref."""
    add_refs = rest[:n_adds]
    o_ref = rest[n_adds]

    x = jnp.concatenate([x_ref[...], xh_ref[...]], axis=0)     # (TM+halo, Cin)
    if pre_slope is not None:
        x = jnp.where(x >= 0, x, pre_slope * x)                # fused leaky_relu
    # im2col: one big MXU matmul with contraction K*Cin instead of K small dots.
    # TODO(synk): tap offsets k*dilation are not sublane aligned; pltpu.roll
    # staging could avoid the per-tap relayout.
    taps = [x[k * dilation:k * dilation + tm, :] for k in range(K)]
    im2col = taps[0] if K == 1 else jnp.concatenate(taps, axis=1)
    acc = jnp.dot(im2col, w_ref[...], preferred_element_type=jnp.float32)
    if pre_scale is not None:
        # exact fold of x/num_kernels: conv(lrelu(s*x)) == s*(lrelu(x)@W) + b
        acc = acc * pre_scale
    acc = acc + b_ref[...]
    for a in add_refs:                                         # fused residual /
        acc = acc + a[...].astype(jnp.float32)                 # xs accumulation
    if post_tanh:
        acc = jnp.tanh(acc)
    o_ref[...] = acc.astype(o_ref.dtype)


def _conv_core(x, w2, b, *, K, dilation, pad_l, pad_r, pre_slope=None,
               pre_scale=None, post_tanh=False, adds=()):
    """x: (T, Cin_pad), w2: (K*Cin_pad, Cout_pad), b: (1, Cout_pad) f32."""
    T, cin_p = x.shape
    kc, cout_p = w2.shape
    assert kc == K * cin_p
    dt = w2.dtype
    halo = (K - 1) * dilation
    t_out = T + pad_l + pad_r - halo
    halo_pad = _round_up(max(halo, 1), 16)
    tm = max(min(TM_TARGET, _round_up(t_out, 16)), halo_pad)
    n_tiles = pl.cdiv(t_out, tm)
    total = (n_tiles + 1) * tm                   # tm >= halo_pad => always in range
    x_full = jnp.pad(x.astype(dt), ((pad_l, total - pad_l - T), (0, 0)))
    # Per-tile halo slab: avoids re-reading a whole neighbour tile for a <=64
    # row overlap (keeps x DMA ~1x instead of 2x).
    x_halo = x_full.reshape(n_tiles + 1, tm, cin_p)[1:, :halo_pad, :]

    adds = tuple(a.astype(dt) for a in adds)
    for a in adds:
        assert a.shape == (t_out, cout_p)
    adds_p = tuple(jnp.pad(a, ((0, n_tiles * tm - t_out), (0, 0))) for a in adds)

    kernel = functools.partial(
        _conv_kernel, K=K, dilation=dilation, tm=tm, n_adds=len(adds),
        pre_slope=pre_slope, pre_scale=pre_scale, post_tanh=post_tanh)

    in_specs = [
        pl.BlockSpec((tm, cin_p), lambda i: (i, 0)),
        pl.BlockSpec((None, halo_pad, cin_p), lambda i: (i, 0, 0)),
        pl.BlockSpec((K * cin_p, cout_p), lambda i: (0, 0)),
        pl.BlockSpec((1, cout_p), lambda i: (0, 0)),
    ]
    in_specs += [pl.BlockSpec((tm, cout_p), lambda i: (i, 0)) for _ in adds_p]

    out = pl.pallas_call(
        kernel,
        grid=(n_tiles,),
        in_specs=in_specs,
        out_specs=pl.BlockSpec((tm, cout_p), lambda i: (i, 0)),
        out_shape=jax.ShapeDtypeStruct((n_tiles * tm, cout_p), dt),
        compiler_params=pltpu.CompilerParams(
            dimension_semantics=("parallel",),
            vmem_limit_bytes=VMEM_LIMIT),
    )(x_full, x_halo, w2, b, *adds_p)
    return out[:t_out]


# ----------------------------------------------------------------------------
# Layer wrappers (operate on prepared, matmul-ready parameters)
# ----------------------------------------------------------------------------
def conv1d(x, cp, pre_slope=None, pre_scale=None, post_tanh=False, adds=()):
    return _conv_core(x, cp['w2'], cp['b'], K=cp['K'], dilation=cp['dilation'],
                      pad_l=cp['pad'], pad_r=cp['pad'], pre_slope=pre_slope,
                      pre_scale=pre_scale, post_tanh=post_tanh, adds=adds)


def conv_transpose1d(x, tp, pre_slope=None, pre_scale=None):
    """Polyphase ConvTranspose1d: one conv over the un-stuffed input producing
    all `stride` phases along the channel axis, interleaved by a row-major
    reshape (no zero-stuffed activations / zero-multiply FLOPs)."""
    T = x.shape[0]
    s = tp['stride']
    l_out = (T - 1) * s + tp['K_orig'] - 2 * tp['padding']
    n = -(-l_out // s)
    pad_r = max(0, n + tp['W'] - 1 - T - tp['A'])
    y = _conv_core(x, tp['w2'], tp['b'], K=tp['W'], dilation=1,
                   pad_l=tp['A'], pad_r=pad_r,
                   pre_slope=pre_slope, pre_scale=pre_scale)
    return y[:n].reshape(n * s, tp['cout_p'])[:l_out]


# ----------------------------------------------------------------------------
# Parameter preprocessing (torch layouts -> lane-padded, im2col-folded layouts)
# ----------------------------------------------------------------------------
def prepare_conv(w_oik, b, dilation, padding, dtype):
    """torch Conv1d weight (Cout, Cin, K) -> (K*Cin_pad, Cout_pad)."""
    cout, cin, K = w_oik.shape
    cin_p, cout_p = _round_up(cin, LANE), _round_up(cout, LANE)
    w = jnp.transpose(w_oik, (2, 1, 0))                      # (K, Cin, Cout)
    w = jnp.pad(w, ((0, 0), (0, cin_p - cin), (0, cout_p - cout)))
    return {
        'w2': w.reshape(K * cin_p, cout_p).astype(dtype),
        'b': jnp.pad(b, (0, cout_p - cout)).reshape(1, cout_p).astype(jnp.float32),
        'K': K, 'dilation': dilation, 'pad': padding,
        'cout': cout, 'cout_p': cout_p,
    }


def prepare_conv_transpose(w_iok, b, stride, padding, dtype):
    """torch ConvTranspose1d weight (Cin, Cout, K) -> polyphase conv weight.

    Output position n = q*stride + r uses only taps k == (r+padding) mod stride;
    those taps are placed in a shared (W, Cin, stride*Cout) weight so a single
    matmul produces all phases of output row q at once."""
    cin, cout, K = w_iok.shape
    s, p = stride, padding
    cin_p, cout_p = _round_up(cin, LANE), _round_up(cout, LANE)
    k_min = [(r + p) % s for r in range(s)]
    n_taps = [max(0, -(-(K - k_min[r]) // s)) for r in range(s)]
    off = [(r + p) // s for r in range(s)]
    A = max([n_taps[r] - 1 - off[r] for r in range(s)] + [0])
    W = A + max(off) + 1
    wc = jnp.zeros((W, cin_p, s * cout_p), jnp.float32)
    bc = jnp.zeros((s * cout_p,), jnp.float32)
    for r in range(s):
        bc = bc.at[r * cout_p:r * cout_p + cout].set(b)
        for j in range(n_taps[r]):
            k = k_min[r] + j * s
            t = A + off[r] - j
            wc = wc.at[t, :cin, r * cout_p:r * cout_p + cout].set(w_iok[:, :, k])
    return {
        'w2': wc.reshape(W * cin_p, s * cout_p).astype(dtype),
        'b': bc.reshape(1, s * cout_p).astype(jnp.float32),
        'W': W, 'A': A, 'stride': s, 'padding': p, 'K_orig': K,
        'cout': cout, 'cout_p': cout_p,
    }


def prepare_params(raw, cfg, dtype):
    nk = len(cfg['resblock_kernel_sizes'])
    pp = {
        'embed': raw['embed'],
        'conv_pre': prepare_conv(raw['conv_pre']['w'], raw['conv_pre']['b'],
                                 1, 3, dtype),
        'ups': [prepare_conv_transpose(u['w'], u['b'], r, (k - r) // 2, dtype)
                for u, r, k in zip(raw['ups'], cfg['upsample_rates'],
                                   cfg['upsample_kernel_sizes'])],
        'resblocks': [],
        'conv_post': prepare_conv(raw['conv_post']['w'], raw['conv_post']['b'],
                                  1, 3, dtype),
    }
    for idx, rb in enumerate(raw['resblocks']):
        j = idx % nk
        ks = cfg['resblock_kernel_sizes'][j]
        ds = cfg['resblock_dilation_sizes'][j]
        pp['resblocks'].append({
            'c1': [prepare_conv(rb['c1'][m]['w'], rb['c1'][m]['b'], ds[m],
                                get_padding(ks, ds[m]), dtype)
                   for m in range(len(ds))],
            'c2': [prepare_conv(rb['c2'][m]['w'], rb['c2'][m]['b'], 1,
                                get_padding(ks, 1), dtype)
                   for m in range(len(ds))],
        })
    return pp


# ----------------------------------------------------------------------------
# Model forward (Generator / ResBlock / CodeHiFiGAN)
# ----------------------------------------------------------------------------
def resblock_forward(rbp, x, acc=None):
    """One ResBlock.  The residual `xt + x` is fused into each c2 conv; the
    running `xs` accumulation is fused into the last c2 conv via `acc`."""
    n = len(rbp['c1'])
    for m in range(n):
        xt = conv1d(x, rbp['c1'][m], pre_slope=LRELU_SLOPE)
        adds = (x,) if (m < n - 1 or acc is None) else (x, acc)
        x = conv1d(xt, rbp['c2'][m], pre_slope=LRELU_SLOPE, adds=adds)
    return x


def generator_forward(pp, cfg, x):
    nk = len(cfg['resblock_kernel_sizes'])
    x = conv1d(x, pp['conv_pre'])
    scale = None
    for i in range(len(cfg['upsample_rates'])):
        # F.leaky_relu(xs/nk) is folded in: leaky_relu is positively homogeneous,
        # so the 1/nk scale is applied to the matmul result inside the kernel.
        x = conv_transpose1d(x, pp['ups'][i], pre_slope=LRELU_SLOPE,
                             pre_scale=scale)
        xs = None
        for j in range(nk):
            xs = resblock_forward(pp['resblocks'][i * nk + j], x, acc=xs)
        x = xs
        scale = 1.0 / nk
    # final leaky_relu uses torch's default 0.01 slope; tanh fused as well
    x = conv1d(x, pp['conv_post'], pre_slope=0.01, pre_scale=scale,
               post_tanh=True)
    return x                      # (T_out, 128); channel 0 is the waveform


def codehifigan_vocoder_forward(pp, cfg, code):
    """CodeHiFiGANVocoder.forward({'code': code}, dur_prediction=False) for a
    cfg with f0=False, no multispkr and no duration prediction."""
    dtype = pp['conv_pre']['w2'].dtype
    mask = code >= 0
    # TODO(synk): data-dependent boolean mask + embedding gather stay in plain
    # JAX (shape is data dependent; not worth a Pallas gather at this size).
    code_flat = code[mask]
    x = pp['embed'][code_flat]                           # (T, D) time-major
    d = x.shape[1]
    x = jnp.pad(x, ((0, 0), (0, _round_up(d, LANE) - d))).astype(dtype)
    y = generator_forward(pp, cfg, x)
    return y[:, 0].astype(jnp.float32)                   # == torch .squeeze()


# ----------------------------------------------------------------------------
# Pure-JAX f32 reference (mirrors the torch module) for validation
# ----------------------------------------------------------------------------
def _lrelu(x, slope):
    return jnp.where(x >= 0, x, slope * x)


def _ref_conv1d(x, w_oik, b, dilation, padding):
    out = lax.conv_general_dilated(
        x.T[None], w_oik, window_strides=(1,), padding=[(padding, padding)],
        rhs_dilation=(dilation,), dimension_numbers=('NCH', 'OIH', 'NCH'),
        precision=lax.Precision.HIGHEST)
    return (out[0] + b[:, None]).T


def _ref_conv_transpose1d(x, w_iok, b, stride, padding):
    K = w_iok.shape[-1]
    w = jnp.flip(w_iok, axis=-1).transpose(1, 0, 2)          # (Cout, Cin, K)
    out = lax.conv_general_dilated(
        x.T[None], w, window_strides=(1,),
        padding=[(K - 1 - padding, K - 1 - padding)], lhs_dilation=(stride,),
        dimension_numbers=('NCH', 'OIH', 'NCH'), precision=lax.Precision.HIGHEST)
    return (out[0] + b[:, None]).T


def reference_forward(raw, cfg, code_flat):
    nk = len(cfg['resblock_kernel_sizes'])
    x = raw['embed'][code_flat]
    x = _ref_conv1d(x, raw['conv_pre']['w'], raw['conv_pre']['b'], 1, 3)
    for i, (u, k) in enumerate(zip(cfg['upsample_rates'],
                                   cfg['upsample_kernel_sizes'])):
        x = _lrelu(x, LRELU_SLOPE)
        x = _ref_conv_transpose1d(x, raw['ups'][i]['w'], raw['ups'][i]['b'],
                                  u, (k - u) // 2)
        xs = None
        for j in range(nk):
            rb = raw['resblocks'][i * nk + j]
            ks = cfg['resblock_kernel_sizes'][j]
            ds = cfg['resblock_dilation_sizes'][j]
            y = x
            for m, dd in enumerate(ds):
                yt = _ref_conv1d(_lrelu(y, LRELU_SLOPE), rb['c1'][m]['w'],
                                 rb['c1'][m]['b'], dd, get_padding(ks, dd))
                yt = _ref_conv1d(_lrelu(yt, LRELU_SLOPE), rb['c2'][m]['w'],
                                 rb['c2'][m]['b'], 1, get_padding(ks, 1))
                y = yt + y
            xs = y if xs is None else xs + y
        x = xs / nk
    x = _lrelu(x, 0.01)
    x = _ref_conv1d(x, raw['conv_post']['w'], raw['conv_post']['b'], 1, 3)
    return jnp.tanh(x)[:, 0]


# ----------------------------------------------------------------------------
# Deterministic synthetic parameters (torch layouts; shapes from __init__)
# ----------------------------------------------------------------------------
def init_params_raw(key, cfg):
    keys = iter(jax.random.split(key, 256))
    nxt = lambda: next(keys)
    w_std = b_std = 0.05

    def rnd(shape, std):
        return std * jax.random.normal(nxt(), shape, dtype=jnp.float32)

    D = cfg['embedding_dim']
    C0 = cfg['upsample_initial_channel']
    raw = {
        'embed': jax.random.normal(nxt(), (cfg['num_embeddings'], D),
                                   dtype=jnp.float32),
        'conv_pre': {'w': rnd((C0, cfg['model_in_dim'], 7), w_std),
                     'b': rnd((C0,), b_std)},
        'ups': [], 'resblocks': [],
    }
    for i, (u, k) in enumerate(zip(cfg['upsample_rates'],
                                   cfg['upsample_kernel_sizes'])):
        cin, cout = C0 // (2 ** i), C0 // (2 ** (i + 1))
        raw['ups'].append({'w': rnd((cin, cout, k), w_std),   # torch (in,out,K)
                           'b': rnd((cout,), b_std)})
    for i in range(len(cfg['upsample_rates'])):
        ch = C0 // (2 ** (i + 1))
        for ks, ds in zip(cfg['resblock_kernel_sizes'],
                          cfg['resblock_dilation_sizes']):
            rb = {'c1': [], 'c2': []}
            for _ in ds:
                rb['c1'].append({'w': rnd((ch, ch, ks), w_std),
                                 'b': rnd((ch,), b_std)})
                rb['c2'].append({'w': rnd((ch, ch, ks), w_std),
                                 'b': rnd((ch,), b_std)})
            raw['resblocks'].append(rb)
    ch_last = C0 // (2 ** len(cfg['upsample_rates']))
    raw['conv_post'] = {'w': rnd((1, ch_last, 7), w_std), 'b': rnd((1,), b_std)}
    return raw


# ----------------------------------------------------------------------------
if __name__ == "__main__":
    cfg = {
        'upsample_rates': [2, 2],
        'upsample_kernel_sizes': [4, 4],
        'upsample_initial_channel': 64,
        'resblock_kernel_sizes': [3, 7],
        'resblock_dilation_sizes': [[1, 3, 5], [1, 3, 5]],
        'num_embeddings': 64,
        'embedding_dim': 32,
        'model_in_dim': 32,
        'f0': False,
    }
    key = jax.random.PRNGKey(0)
    pkey, ckey = jax.random.split(key)
    raw = init_params_raw(pkey, cfg)

    # code: (batch=1, seq=8) non-negative discrete units
    code = jax.random.randint(ckey, (1, 8), 0, cfg['num_embeddings'],
                              dtype=jnp.int32)
    expected_len = code.shape[1]
    for u in cfg['upsample_rates']:
        expected_len *= u

    # Pure-JAX f32 reference of the torch forward.
    ref = jax.block_until_ready(reference_forward(raw, cfg, code[code >= 0]))
    assert ref.shape == (expected_len,)

    # Pallas path, f32 compute: validates the kernel algebra.
    wav32 = codehifigan_vocoder_forward(
        prepare_params(raw, cfg, jnp.float32), cfg, code)
    wav32 = jax.block_until_ready(wav32)
    assert wav32.shape == (expected_len,) and wav32.dtype == jnp.float32
    err32 = float(jnp.max(jnp.abs(wav32 - ref)))
    assert bool(jnp.allclose(wav32, ref, atol=1e-2, rtol=1e-1)), err32

    # Pallas path, bf16 activations/weights with f32 accumulation (production).
    wav = codehifigan_vocoder_forward(
        prepare_params(raw, cfg, jnp.bfloat16), cfg, code)
    wav = jax.block_until_ready(wav)
    assert wav.shape == (expected_len,) and wav.dtype == jnp.float32
    assert bool(jnp.all(jnp.isfinite(wav)))
    assert bool(jnp.all(jnp.abs(wav) <= 1.0))        # tanh-bounded waveform
    assert bool(jnp.allclose(wav, ref, atol=5e-2, rtol=5e-1))
    print("KERNEL_OK")
</pallas_src>

<mosaic_0001>
module attributes {stable_mosaic.version = 11 : i64} {
  func.func @_conv_kernel(%arg0: i32, %arg1: memref<16x128xf32, #tpu.memory_space<vmem>>, %arg2: memref<1x16x128xf32, #tpu.memory_space<vmem>>, %arg3: memref<896x128xf32, #tpu.memory_space<vmem>>, %arg4: memref<1x128xf32, #tpu.memory_space<vmem>>, %arg5: memref<16x128xf32, #tpu.memory_space<vmem>>) attributes {dimension_semantics = [#tpu.dimension_semantics<parallel>], iteration_bounds = array<i64: 1>, scalar_prefetch = 0 : i64, scratch_operands = 0 : i64, tpu.core_type = #tpu.core_type<tc>, window_params = [{transform_indices = @transform_0, window_bounds = array<i64: 16, 128>}, {transform_indices = @transform_1, window_bounds = array<i64: 1, 16, 128>}, {pipeline_mode = #tpu.pipeline_mode<synchronous>, transform_indices = @transform_2, window_bounds = array<i64: 896, 128>}, {pipeline_mode = #tpu.pipeline_mode<synchronous>, transform_indices = @transform_3, window_bounds = array<i64: 1, 128>}, {transform_indices = @transform_4, window_bounds = array<i64: 16, 128>}]} {
    %c0 = arith.constant 0 : index
    %c0_0 = arith.constant 0 : index
    %0 = vector.load %arg1[%c0, %c0_0] : memref<16x128xf32, #tpu.memory_space<vmem>>, vector<16x128xf32>
    %c0_1 = arith.constant 0 : index
    %c0_2 = arith.constant 0 : index
    %c0_3 = arith.constant 0 : index
    %1 = vector.load %arg2[%c0_1, %c0_2, %c0_3] : memref<1x16x128xf32, #tpu.memory_space<vmem>>, vector<1x16x128xf32>
    %2 = vector.shape_cast %1 : vector<1x16x128xf32> to vector<16x128xf32>
    %3 = tpu.concatenate %0, %2 in 0 : vector<16x128xf32>, vector<16x128xf32> -> vector<32x128xf32>
    %4 = vector.extract_strided_slice %3 {offsets = [0, 0], sizes = [16, 128], strides = [1, 1]} : vector<32x128xf32> to vector<16x128xf32>
    %5 = vector.extract_strided_slice %3 {offsets = [1, 0], sizes = [16, 128], strides = [1, 1]} : vector<32x128xf32> to vector<16x128xf32>
    %6 = vector.extract_strided_slice %3 {offsets = [2, 0], sizes = [16, 128], strides = [1, 1]} : vector<32x128xf32> to vector<16x128xf32>
    %7 = vector.extract_strided_slice %3 {offsets = [3, 0], sizes = [16, 128], strides = [1, 1]} : vector<32x128xf32> to vector<16x128xf32>
    %8 = vector.extract_strided_slice %3 {offsets = [4, 0], sizes = [16, 128], strides = [1, 1]} : vector<32x128xf32> to vector<16x128xf32>
    %9 = vector.extract_strided_slice %3 {offsets = [5, 0], sizes = [16, 128], strides = [1, 1]} : vector<32x128xf32> to vector<16x128xf32>
    %10 = vector.extract_strided_slice %3 {offsets = [6, 0], sizes = [16, 128], strides = [1, 1]} : vector<32x128xf32> to vector<16x128xf32>
    %11 = tpu.concatenate %4, %5, %6, %7, %8, %9, %10 in 1 : vector<16x128xf32>, vector<16x128xf32>, vector<16x128xf32>, vector<16x128xf32>, vector<16x128xf32>, vector<16x128xf32>, vector<16x128xf32> -> vector<16x896xf32>
    %c0_4 = arith.constant 0 : index
    %c0_5 = arith.constant 0 : index
    %12 = vector.load %arg3[%c0_4, %c0_5] : memref<896x128xf32, #tpu.memory_space<vmem>>, vector<896x128xf32>
    %cst = arith.constant dense<0.000000e+00> : vector<16x128xf32>
    %13 = tpu.matmul %11, %12, %cst {dimension_numbers = #tpu.dot_dimension_numbers<[1], [0], [0], [1], [0, 0, 1, 1], [], []>} : vector<16x896xf32>, vector<896x128xf32>, vector<16x128xf32> -> vector<16x128xf32>
    %c0_6 = arith.constant 0 : index
    %c0_7 = arith.constant 0 : index
    %14 = vector.load %arg4[%c0_6, %c0_7] : memref<1x128xf32, #tpu.memory_space<vmem>>, vector<1x128xf32>
    %15 = vector.broadcast %14 : vector<1x128xf32> to vector<16x128xf32>
    %16 = arith.addf %13, %15 : vector<16x128xf32>
    %c0_8 = arith.constant 0 : index
    %c0_9 = arith.constant 0 : index
    %17 = vector.load %arg5[%c0_8, %c0_9] : memref<16x128xf32, #tpu.memory_space<vmem>>, vector<16x128xf32>
    tpu.vector_store %arg5[%c0_8, %c0_9], %16 {strides = array<i32>} : memref<16x128xf32, #tpu.memory_space<vmem>>, vector<16x128xf32>,
    return
  }
  func.func @transform_0(%arg0: i32) -> (i32, i32) {
    %c0_i32 = arith.constant 0 : i32
    %c0_i32_0 = arith.constant 0 : i32
    return %arg0, %c0_i32 : i32, i32
  }
  func.func @transform_1(%arg0: i32) -> (i32, i32, i32) {
    %c0_i32 = arith.constant 0 : i32
    %c0_i32_0 = arith.constant 0 : i32
    %c0_i32_1 = arith.constant 0 : i32
    return %arg0, %c0_i32, %c0_i32_0 : i32, i32, i32
  }
  func.func @transform_2(%arg0: i32) -> (i32, i32) {
    %c0_i32 = arith.constant 0 : i32
    %c0_i32_0 = arith.constant 0 : i32
    %c0_i32_1 = arith.constant 0 : i32
    return %c0_i32, %c0_i32_0 : i32, i32
  }
  func.func @transform_3(%arg0: i32) -> (i32, i32) {
    %c0_i32 = arith.constant 0 : i32
    %c0_i32_0 = arith.constant 0 : i32
    %c0_i32_1 = arith.constant 0 : i32
    return %c0_i32, %c0_i32_0 : i32, i32
  }
  func.func @transform_4(%arg0: i32) -> (i32, i32) {
    %c0_i32 = arith.constant 0 : i32
    %c0_i32_0 = arith.constant 0 : i32
    return %arg0, %c0_i32 : i32, i32
  }
}

</mosaic_0001>

<bundles_post_ra>
// kernel: tpu_custom_call.1
= control target key start
LH: loop header
LB: loop body
LE: loop exit
PB: predicated region body
PF: predicated region fallthrough
CT: control target
= control target key end

     0   :  { %9 = vsyncpa [#allocation3], 0  ;;  %s920_s0 = inlined_call_operand.hbm [shape: f32[32,128], index: 0, kind: input, shape index: {}]   ;;  %s921_s1 = inlined_call_operand.hbm [shape: f32[1,16,128], index: 1, kind: input, shape index: {}]   ;;  %s922_s2 = inlined_call_operand.hbm [shape: f32[896,128], index: 2, kind: input, shape index: {}]   ;;  %s923_s3 = inlined_call_operand.vmem [shape: f32[1,128], index: 3, kind: input, shape index: {}]   ;;  %s924_s4 = inlined_call_operand.hbm [shape: f32[16,128], index: 4, kind: output, shape index: {}]  }
   0x1   :  { %10 = vsyncpa [#allocation6], 0 }
   0x2   :  { %11 = vsyncpa [#allocation4], 0  ;;  %s812_s15 = smov [#allocation5]   ;;  %s813_s17 = smov [#allocation2]  }
   0x3   :  { %s29_s16 = sshll.u32 %s812_s15, 4  ;;  %s17_s18 = sshll.u32 %s813_s17, 4  ;;  %s30_s16 = int_to_ptr.vmem [resolvable:$true] %s29_s16  ;;  %s18_s18 = int_to_ptr.vmem [resolvable:$true] %s17_s18 }
   0x4   :  { %s734_s19 = scalar_lea.vmem %s30_s16, 256  ;;  %p739_p1 = scmp.lt.s32.totalorder %s30_s16, %s30_s16 }
   0x5   :  { %p735_p0 = scmp.ne.s32.totalorder %s30_s16, %s734_s19  ;;  %p740_p2 = scmp.lt.s32.totalorder %s734_s19, %s734_s19 }
   0x7   :  { %p741_p3 = por %p740_p2, %p739_p1 }
   0x9   :  { %p742_p4 = pnand %p741_p3, %p735_p0 }
   0xb   :  { %745 = shalt.err (!%p742_p4)
}
   0xc   :  { %s814_s20 = smov 128   ;;  %s815_s21 = smov 8  }
   0xd   :  { %35 = dma.hbm_to_vmem [thread:$0]  %s921_s1, 256, %s30_s16, [#allocation6], %s814_s20, %s814_s20, %s815_s21  }
   0xe   :  { %s754_s24 = scalar_lea.vmem %s18_s18, 256  ;;  %p759_p6 = scmp.lt.s32.totalorder %s18_s18, %s18_s18 }
   0xf   :  { %p755_p5 = scmp.ne.s32.totalorder %s18_s18, %s754_s24  ;;  %p760_p7 = scmp.lt.s32.totalorder %s754_s24, %s754_s24 }
  0x11   :  { %p761_p8 = por %p760_p7, %p759_p6 }
  0x13   :  { %p762_p9 = pnand %p761_p8, %p755_p5 }
  0x15   :  { %765 = shalt.err (!%p762_p9)
}
  0x16   :  { %23 = dma.hbm_to_vmem [thread:$0]  %s920_s0, 256, %s18_s18, [#allocation3], %s814_s20, %s814_s20, %s815_s21  }
  0x17   :  { %s816_s27 = smov [#allocation7]  }
  0x18   :  { %s41_s28 = sshll.u32 %s816_s27, 4  ;;  %s42_s28 = int_to_ptr.vmem [resolvable:$true] %s41_s28 }
  0x19   :  { %s774_s29 = scalar_lea.vmem %s42_s28, 14336  ;;  %p779_p11 = scmp.lt.s32.totalorder %s42_s28, %s42_s28 }
  0x1a   :  { %p775_p10 = scmp.ne.s32.totalorder %s42_s28, %s774_s29  ;;  %p780_p12 = scmp.lt.s32.totalorder %s774_s29, %s774_s29 }
  0x1c   :  { %p781_p13 = por %p780_p12, %p779_p11 }
  0x1e   :  { %p782_p0 = pnand %p781_p13, %p775_p10 }
  0x20   :  { %785 = shalt.err (!%p782_p0)
}
  0x21   :  { %47 = dma.hbm_to_vmem [thread:$0]  %s922_s2, 14336, %s42_s28, [#allocation6], %s814_s20, %s814_s20, %s815_s21  }
  0x22   :  { %806 = dma.done.wait [#allocation3], 256  }
  0x23   :  { %807 = vsyncadd [#allocation3], 4294967040 }
  0x24   :  { %808 = dma.done.wait [#allocation6], 14592  }
  0x25   :  { %809 = vsyncadd [#allocation6], 4294952704  ;;  %v144_v0 = vld [vmem:[#allocation7 + $0xf8] sm:$0xff]  ;;  %v143_v2 = vld [vmem:[#allocation7 + $0xf0] sm:$0xff]  ;;  %vm65_vm0 = vcmask 1046528   ;;  %vm81_vm1 = vcmask 1044480  }
  0x26   :  { %v128_v1 = vld [vmem:[#allocation7 + $0x78] sm:$0xff]  ;;  %553 = vmatprep.subr.mxu0 %v144_v0  ;;  %v127_v4 = vld [vmem:[#allocation7 + $0x70] sm:$0xff]  ;;  %v142_v6 = vld [vmem:[#allocation7 + $0xe8] sm:$0xff]  ;;  %vm73_vm2 = vcmask 1045504   ;;  %vm97_vm3 = vcmask 1042432   ;;  %vm89_vm4 = vcmask 1043456  }
  0x27   :  { %v176_v3 = vld [vmem:[#allocation7 + $0x1f8] sm:$0xff]  ;;  %554 = vmatpush3.msra.mxu0 %v128_v1  ;;  %v175_v7 = vld [vmem:[#allocation7 + $0x1f0] sm:$0xff]  ;;  %v126_v8 = vld [vmem:[#allocation7 + $0x68] sm:$0xff]  ;;  %vm105_vm5 = vcmask 1041408  }
  0x28   :  { %v160_v5 = vld [vmem:[#allocation7 + $0x178] sm:$0xff]  ;;  %591 = vmatprep.subr.mxu1 %v176_v3  ;;  %555 = vmatprep.subr.mxu0 %v143_v2  ;;  %v159_v9 = vld [vmem:[#allocation7 + $0x170] sm:$0xff]  ;;  %v174_v10 = vld [vmem:[#allocation7 + $0x1e8] sm:$0xff] }
  0x29   :  { %592 = vmatpush3.msra.mxu1 %v160_v5  ;;  %556 = vmatpush3.msra.mxu0 %v127_v4  ;;  %v141_v11 = vld [vmem:[#allocation7 + $0xe0] sm:$0xff]  ;;  %v158_v12 = vld [vmem:[#allocation7 + $0x168] sm:$0xff]  ;;  %v140_v15 = vld [vmem:[#allocation7 + $0xd8] sm:$0xff] }
  0x2a   :  { %593 = vmatprep.subr.mxu1 %v175_v7  ;;  %557 = vmatprep.subr.mxu0 %v142_v6  ;;  %v125_v13 = vld [vmem:[#allocation7 + $0x60] sm:$0xff]  ;;  %v124_v17 = vld [vmem:[#allocation7 + $0x58] sm:$0xff]  ;;  %v139_v19 = vld [vmem:[#allocation7 + $0xd0] sm:$0xff] }
  0x2b   :  { %594 = vmatpush3.msra.mxu1 %v159_v9  ;;  %v173_v14 = vld [vmem:[#allocation7 + $0x1e0] sm:$0xff]  ;;  %558 = vmatpush3.msra.mxu0 %v126_v8  ;;  %v172_v18 = vld [vmem:[#allocation7 + $0x1d8] sm:$0xff]  ;;  %v123_v21 = vld [vmem:[#allocation7 + $0x50] sm:$0xff] }
  0x2c   :  { %595 = vmatprep.subr.mxu1 %v174_v10  ;;  %v157_v16 = vld [vmem:[#allocation7 + $0x160] sm:$0xff]  ;;  %559 = vmatprep.subr.mxu0 %v141_v11  ;;  %v156_v20 = vld [vmem:[#allocation7 + $0x158] sm:$0xff]  ;;  %v171_v22 = vld [vmem:[#allocation7 + $0x1d0] sm:$0xff] }
  0x2d   :  { %596 = vmatpush3.msra.mxu1 %v158_v12  ;;  %560 = vmatpush3.msra.mxu0 %v125_v13  ;;  %v138_v23 = vld [vmem:[#allocation7 + $0xc8] sm:$0xff]  ;;  %v155_v24 = vld [vmem:[#allocation7 + $0x150] sm:$0xff]  ;;  %v137_v27 = vld [vmem:[#allocation7 + $0xc0] sm:$0xff] }
  0x2e   :  { %597 = vmatprep.subr.mxu1 %v173_v14  ;;  %561 = vmatprep.subr.mxu0 %v140_v15  ;;  %v122_v25 = vld [vmem:[#allocation7 + $0x48] sm:$0xff]  ;;  %v121_v29 = vld [vmem:[#allocation7 + $0x40] sm:$0xff]  ;;  %v136_v31 = vld [vmem:[#allocation7 + $0xb8] sm:$0xff] }
  0x2f   :  { %598 = vmatpush3.msra.mxu1 %v157_v16  ;;  %562 = vmatpush3.msra.mxu0 %v124_v17  ;;  %v170_v26 = vld [vmem:[#allocation7 + $0x1c8] sm:$0xff]  ;;  %v169_v30 = vld [vmem:[#allocation7 + $0x1c0] sm:$0xff]  ;;  %v120_v33 = vld [vmem:[#allocation7 + $0x38] sm:$0xff] }
  0x30   :  { %599 = vmatprep.subr.mxu1 %v172_v18  ;;  %563 = vmatprep.subr.mxu0 %v139_v19  ;;  %v154_v28 = vld [vmem:[#allocation7 + $0x148] sm:$0xff]  ;;  %v153_v32 = vld [vmem:[#allocation7 + $0x140] sm:$0xff]  ;;  %v168_v34 = vld [vmem:[#allocation7 + $0x1b8] sm:$0xff] }
  0x31   :  { %600 = vmatpush3.msra.mxu1 %v156_v20  ;;  %564 = vmatpush3.msra.mxu0 %v123_v21  ;;  %v135_v35 = vld [vmem:[#allocation7 + $0xb0] sm:$0xff]  ;;  %v152_v36 = vld [vmem:[#allocation7 + $0x138] sm:$0xff]  ;;  %v134_v39 = vld [vmem:[#allocation7 + $0xa8] sm:$0xff] }
  0x32   :  { %601 = vmatprep.subr.mxu1 %v171_v22  ;;  %565 = vmatprep.subr.mxu0 %v138_v23  ;;  %v119_v37 = vld [vmem:[#allocation7 + $0x30] sm:$0xff]  ;;  %v118_v41 = vld [vmem:[#allocation7 + $0x28] sm:$0xff]  ;;  %v133_v43 = vld [vmem:[#allocation7 + $0xa0] sm:$0xff] }
  0x33   :  { %602 = vmatpush3.msra.mxu1 %v155_v24  ;;  %566 = vmatpush3.msra.mxu0 %v122_v25  ;;  %v167_v38 = vld [vmem:[#allocation7 + $0x1b0] sm:$0xff]  ;;  %v166_v42 = vld [vmem:[#allocation7 + $0x1a8] sm:$0xff]  ;;  %v117_v44 = vld [vmem:[#allocation7 + $0x20] sm:$0xff] }
  0x34   :  { %603 = vmatprep.subr.mxu1 %v170_v26  ;;  %567 = vmatprep.subr.mxu0 %v137_v27  ;;  %v151_v40 = vld [vmem:[#allocation7 + $0x130] sm:$0xff]  ;;  %v150_v45 = vld [vmem:[#allocation7 + $0x128] sm:$0xff]  ;;  %v165_v46 = vld [vmem:[#allocation7 + $0x1a0] sm:$0xff] }
  0x35   :  { %604 = vmatpush3.msra.mxu1 %v154_v28  ;;  %568 = vmatpush3.msra.mxu0 %v121_v29  ;;  %v861_v47 = vld [vmem:[#allocation2] sm:$0xff]  ;;  %v863_v48 = vld [vmem:[#allocation2 + $0x8] sm:$0xff]  ;;  %v132_v49 = vld [vmem:[#allocation7 + $0x98] sm:$0xff] }
  0x36   :  { %605 = vmatprep.subr.mxu1 %v169_v30  ;;  %569 = vmatprep.subr.mxu0 %v136_v31  ;;  %v149_v50 = vld [vmem:[#allocation7 + $0x120] sm:$0xff]  ;;  %v116_v51 = vld [vmem:[#allocation7 + $0x18] sm:$0xff]  ;;  %v131_v53 = vld [vmem:[#allocation7 + $0x90] sm:$0xff]  ;;  %v66_v55 = vrot.slane %v861_v47, 1  ;;  %v67_v56 = vrot.slane %v863_v48, 1  ;;  %v82_v1 = vrot.slane %v861_v47, 3 }
  0x37   :  { %606 = vmatpush3.msra.mxu1 %v153_v32  ;;  %570 = vmatpush3.msra.mxu0 %v120_v33  ;;  %v164_v52 = vld [vmem:[#allocation7 + $0x198] sm:$0xff]  ;;  %v115_v57 = vld [vmem:[#allocation7 + $0x10] sm:$0xff]  ;;  %v130_v59 = vld [vmem:[#allocation7 + $0x88] sm:$0xff]  ;;  %v83_v2 = vrot.slane %v863_v48, 3  ;;  %v74_v5 = vrot.slane %v861_v47, 2  ;;  %v75_v6 = vrot.slane %v863_v48, 2 }
  0x38   :  { %607 = vmatprep.subr.mxu1 %v168_v34  ;;  %571 = vmatprep.subr.mxu0 %v135_v35  ;;  %v148_v54 = vld [vmem:[#allocation7 + $0x118] sm:$0xff]  ;;  %v163_v58 = vld [vmem:[#allocation7 + $0x190] sm:$0xff]  ;;  %v114_v61 = vld [vmem:[#allocation7 + $0x8] sm:$0xff]  ;;  %v68_v0 = vsel %vm65_vm0, %v66_v55, %v67_v56 }
  0x39   :  { %608 = vmatpush3.msra.mxu1 %v152_v36  ;;  %572 = vmatpush3.msra.mxu0 %v119_v37  ;;  %v147_v60 = vld [vmem:[#allocation7 + $0x110] sm:$0xff]  ;;  %v162_v62 = vld [vmem:[#allocation7 + $0x188] sm:$0xff]  ;;  %v129_v63 = vld [vmem:[#allocation7 + $0x80] sm:$0xff]  ;;  %v84_v10 = vsel %vm81_vm1, %v82_v1, %v83_v2  ;;  %v76_v12 = vsel %vm73_vm2, %v74_v5, %v75_v6  ;;  %v90_v1 = vrot.slane %v861_v47, 4 }
  0x3a   :  { %609 = vmatprep.subr.mxu1 %v167_v38  ;;  %573 = vmatprep.subr.mxu0 %v134_v39  ;;  %v113_v3 = vld [vmem:[#allocation7] sm:$0xff]  ;;  %v146_v4 = vld [vmem:[#allocation7 + $0x108] sm:$0xff]  ;;  %v208_v8 = vld [vmem:[#allocation7 + $0x2f8] sm:$0xff] }
  0x3b   :  { %610 = vmatpush3.msra.mxu1 %v151_v40  ;;  %574 = vmatpush3.msra.mxu0 %v118_v41  ;;  %v161_v7 = vld [vmem:[#allocation7 + $0x180] sm:$0xff]  ;;  %v192_v11 = vld [vmem:[#allocation7 + $0x278] sm:$0xff]  ;;  %v207_v13 = vld [vmem:[#allocation7 + $0x2f0] sm:$0xff] }
  0x3c   :  { %611 = vmatprep.subr.mxu1 %v166_v42  ;;  %575 = vmatprep.subr.mxu0 %v133_v43  ;;  %v145_v9 = vld [vmem:[#allocation7 + $0x100] sm:$0xff]  ;;  %v191_v14 = vld [vmem:[#allocation7 + $0x270] sm:$0xff]  ;;  %v224_v15 = vld [vmem:[#allocation7 + $0x378] sm:$0xff] }
  0x3d   :  { %612 = vmatpush3.msra.mxu1 %v150_v45  ;;  %576 = vmatpush3.msra.mxu0 %v117_v44  ;;  %v206_v16 = vld [vmem:[#allocation7 + $0x2e8] sm:$0xff]  ;;  %v223_v18 = vld [vmem:[#allocation7 + $0x370] sm:$0xff]  ;;  %v205_v19 = vld [vmem:[#allocation7 + $0x2e0] sm:$0xff] }
  0x3e   :  { %613 = vmatprep.subr.mxu1 %v165_v46  ;;  %577 = vmatprep.subr.mxu0 %v132_v49  ;;  %v190_v17 = vld [vmem:[#allocation7 + $0x268] sm:$0xff]  ;;  %v189_v20 = vld [vmem:[#allocation7 + $0x260] sm:$0xff]  ;;  %v204_v22 = vld [vmem:[#allocation7 + $0x2d8] sm:$0xff] }
  0x3f   :  { %614 = vmatpush3.msra.mxu1 %v149_v50  ;;  %578 = vmatpush3.msra.mxu0 %v116_v51  ;;  %v222_v21 = vld [vmem:[#allocation7 + $0x368] sm:$0xff]  ;;  %v188_v23 = vld [vmem:[#allocation7 + $0x258] sm:$0xff]  ;;  %v221_v24 = vld [vmem:[#allocation7 + $0x360] sm:$0xff] }
  0x40   :  { %615 = vmatprep.subr.mxu1 %v164_v52  ;;  %579 = vmatprep.subr.mxu0 %v131_v53  ;;  %v203_v25 = vld [vmem:[#allocation7 + $0x2d0] sm:$0xff]  ;;  %v220_v27 = vld [vmem:[#allocation7 + $0x358] sm:$0xff]  ;;  %v202_v28 = vld [vmem:[#allocation7 + $0x2c8] sm:$0xff] }
  0x41   :  { %616 = vmatpush3.msra.mxu1 %v148_v54  ;;  %580 = vmatpush3.msra.mxu0 %v115_v57  ;;  %v187_v26 = vld [vmem:[#allocation7 + $0x250] sm:$0xff]  ;;  %v186_v29 = vld [vmem:[#allocation7 + $0x248] sm:$0xff]  ;;  %v201_v31 = vld [vmem:[#allocation7 + $0x2c0] sm:$0xff] }
  0x42   :  { %617 = vmatprep.subr.mxu1 %v163_v58  ;;  %581 = vmatprep.subr.mxu0 %v130_v59  ;;  %v219_v30 = vld [vmem:[#allocation7 + $0x350] sm:$0xff]  ;;  %v185_v32 = vld [vmem:[#allocation7 + $0x240] sm:$0xff]  ;;  %v218_v33 = vld [vmem:[#allocation7 + $0x348] sm:$0xff] }
  0x43   :  { %618 = vmatpush3.msra.mxu1 %v147_v60  ;;  %582 = vmatpush3.msra.mxu0 %v114_v61  ;;  %v200_v34 = vld [vmem:[#allocation7 + $0x2b8] sm:$0xff]  ;;  %v217_v36 = vld [vmem:[#allocation7 + $0x340] sm:$0xff]  ;;  %v881_v37 = vld [vmem:[#allocation5] sm:$0xff]  ;;  %v98_v61 = vrot.slane %v861_v47, 5 }
  0x44   :  { %619 = vmatprep.subr.mxu1 %v162_v62  ;;  %583 = vmatprep.subr.mxu0 %v129_v63  ;;  %v184_v35 = vld [vmem:[#allocation7 + $0x238] sm:$0xff]  ;;  %v199_v38 = vld [vmem:[#allocation7 + $0x2b0] sm:$0xff]  ;;  %v198_v41 = vld [vmem:[#allocation7 + $0x2a8] sm:$0xff]  ;;  %v69_v42 = vrot.slane %v881_v37, 1  ;;  %v85_v50 = vrot.slane %v881_v37, 3  ;;  %v77_v54 = vrot.slane %v881_v37, 2 }
  0x45   :  { %296 = vmatprep.mubr.f32.mxu0 %v68_v0  ;;  %584 = vmatpush3.msra.mxu0 %v113_v3  ;;  %v183_v39 = vld [vmem:[#allocation7 + $0x230] sm:$0xff]  ;;  %v216_v40 = vld [vmem:[#allocation7 + $0x338] sm:$0xff]  ;;  %v182_v43 = vld [vmem:[#allocation7 + $0x228] sm:$0xff]  ;;  %v99_v62 = vrot.slane %v863_v48, 5 }
  0x46   :  { %620 = vmatpush3.msra.mxu1 %v146_v4  ;;  %297 = vmatmul.mubr.f32.vlgmr.msra.gmra.mxu0 %v861_v47  ;;  %v215_v44 = vld [vmem:[#allocation7 + $0x330] sm:$0xff]  ;;  %v197_v45 = vld [vmem:[#allocation7 + $0x2a0] sm:$0xff]  ;;  %v214_v49 = vld [vmem:[#allocation7 + $0x328] sm:$0xff]  ;;  %v70_v52 = vsel %vm65_vm0, %v67_v56, %v69_v42  ;;  %v86_v58 = vsel %vm81_vm1, %v83_v2, %v85_v50  ;;  %v78_v56 = vsel %vm73_vm2, %v75_v6, %v77_v54  ;;  %v91_v2 = vrot.slane %v863_v48, 4 }
  0x47   :  { %621 = vmatprep.subr.mxu1 %v161_v7  ;;  %629 = vmatprep.subr.mxu0 %v208_v8  ;;  %v181_v46 = vld [vmem:[#allocation7 + $0x220] sm:$0xff]  ;;  %v196_v51 = vld [vmem:[#allocation7 + $0x298] sm:$0xff]  ;;  %v195_v55 = vld [vmem:[#allocation7 + $0x290] sm:$0xff]  ;;  %v101_v4 = vrot.slane %v881_v37, 5  ;;  %v106_v7 = vrot.slane %v861_v47, 6  ;;  %v107_v8 = vrot.slane %v863_v48, 6 }
  0x48   :  { %622 = vmatpush3.msra.mxu1 %v145_v9  ;;  %371 = vmatprep.mubr.f32.mxu1 %v84_v10  ;;  %v180_v53 = vld [vmem:[#allocation7 + $0x218] sm:$0xff]  ;;  %v213_v57 = vld [vmem:[#allocation7 + $0x320] sm:$0xff]  ;;  %v179_v59 = vld [vmem:[#allocation7 + $0x210] sm:$0xff]  ;;  %v100_v9 = vsel %vm97_vm3, %v98_v61, %v99_v62  ;;  %v92_v10 = vsel %vm89_vm4, %v90_v1, %v91_v2 }
  0x49   :  { %630 = vmatpush3.msra.mxu0 %v192_v11  ;;  %372 = vmatmul.mubr.f32.vlgmr.msra.gmra.mxu1 %v76_v12  ;;  %v194_v60 = vld [vmem:[#allocation7 + $0x288] sm:$0xff]  ;;  %v212_v63 = vld [vmem:[#allocation7 + $0x318] sm:$0xff]  ;;  %v193_v3 = vld [vmem:[#allocation7 + $0x280] sm:$0xff]  ;;  %v93_v12 = vrot.slane %v881_v37, 4  ;;  %v102_v47 = vsel %vm97_vm3, %v99_v62, %v101_v4 }
  0x4a   :  { %631 = vmatprep.subr.mxu0 %v207_v13  ;;  %685 = vmatprep.subr.mxu1 %v224_v15  ;;  %v178_v0 = vld [vmem:[#allocation7 + $0x208] sm:$0xff]  ;;  %v211_v5 = vld [vmem:[#allocation7 + $0x310] sm:$0xff]  ;;  %v177_v6 = vld [vmem:[#allocation7 + $0x200] sm:$0xff]  ;;  %v109_v13 = vrot.slane %v881_v37, 6 }
  0x4b   :  { %632 = vmatpush3.msra.mxu0 %v191_v14  ;;  %686 = vmatpush3.msra.mxu1 %v224_v15  ;;  %v210_v11 = vld [vmem:[#allocation7 + $0x308] sm:$0xff]  ;;  %v108_v14 = vsel %vm105_vm5, %v106_v7, %v107_v8  ;;  %v94_v15 = vsel %vm89_vm4, %v91_v2, %v93_v12 }
  0x4c   :  { %633 = vmatprep.subr.mxu0 %v206_v16  ;;  %687 = vmatprep.subr.mxu1 %v223_v18  ;;  %v110_v16 = vsel %vm105_vm5, %v107_v8, %v109_v13 }
  0x4d   :  { %634 = vmatpush3.msra.mxu0 %v190_v17  ;;  %688 = vmatpush3.msra.mxu1 %v223_v18 }
  0x4e   :  { %635 = vmatprep.subr.mxu0 %v205_v19  ;;  %689 = vmatprep.subr.mxu1 %v222_v21 }
  0x4f   :  { %636 = vmatpush3.msra.mxu0 %v189_v20  ;;  %690 = vmatpush3.msra.mxu1 %v222_v21 }
  0x50   :  { %637 = vmatprep.subr.mxu0 %v204_v22  ;;  %691 = vmatprep.subr.mxu1 %v221_v24 }
  0x51   :  { %638 = vmatpush3.msra.mxu0 %v188_v23  ;;  %692 = vmatpush3.msra.mxu1 %v221_v24  ;;  %v552_v23 = vld [vmem:[%s923_s3] ss:$0 sm:$0xff]  ;;  %s817_s3 = smov [#allocation8]  }
  0x52   :  { %639 = vmatprep.subr.mxu0 %v203_v25  ;;  %693 = vmatprep.subr.mxu1 %v220_v27  ;;  %s539_s5 = sshll.u32 %s817_s3, 4  ;;  %s540_s5 = int_to_ptr.vmem [resolvable:$true] %s539_s5 }
  0x53   :  { %640 = vmatpush3.msra.mxu0 %v187_v26  ;;  %694 = vmatpush3.msra.mxu1 %v220_v27  ;;  %s786_s6 = scalar_lea.vmem %s540_s5, 256  ;;  %p791_p2 = scmp.lt.s32.totalorder %s540_s5, %s540_s5 }
  0x54   :  { %641 = vmatprep.subr.mxu0 %v202_v28  ;;  %695 = vmatprep.subr.mxu1 %v219_v30  ;;  %p787_p1 = scmp.ne.s32.totalorder %s540_s5, %s786_s6  ;;  %p792_p3 = scmp.lt.s32.totalorder %s786_s6, %s786_s6 }
  0x55   :  { %642 = vmatpush3.msra.mxu0 %v186_v29  ;;  %696 = vmatpush3.msra.mxu1 %v219_v30 }
  0x56   :  { %643 = vmatprep.subr.mxu0 %v201_v31  ;;  %697 = vmatprep.subr.mxu1 %v218_v33  ;;  %p793_p4 = por %p792_p3, %p791_p2 }
  0x57   :  { %644 = vmatpush3.msra.mxu0 %v185_v32  ;;  %698 = vmatpush3.msra.mxu1 %v218_v33 }
  0x58   :  { %645 = vmatprep.subr.mxu0 %v200_v34  ;;  %699 = vmatprep.subr.mxu1 %v217_v36  ;;  %p794_p5 = pnand %p793_p4, %p787_p1 }
  0x59   :  { %646 = vmatpush3.msra.mxu0 %v184_v35  ;;  %700 = vmatpush3.msra.mxu1 %v217_v36 }
  0x5a   :  { %647 = vmatprep.subr.mxu0 %v199_v38  ;;  %701 = vmatprep.subr.mxu1 %v216_v40 }
  0x5b   :  { %648 = vmatpush3.msra.mxu0 %v183_v39  ;;  %702 = vmatpush3.msra.mxu1 %v216_v40 }
  0x5c   :  { %649 = vmatprep.subr.mxu0 %v198_v41  ;;  %703 = vmatprep.subr.mxu1 %v215_v44 }
  0x5d   :  { %650 = vmatpush3.msra.mxu0 %v182_v43  ;;  %704 = vmatpush3.msra.mxu1 %v215_v44 }
  0x5e   :  { %651 = vmatprep.subr.mxu0 %v197_v45  ;;  %705 = vmatprep.subr.mxu1 %v214_v49 }
  0x5f   :  { %652 = vmatpush3.msra.mxu0 %v181_v46  ;;  %301 = vmatprep.mubr.f32.mxu0 %v70_v52 }
  0x60   :  { %653 = vmatprep.subr.mxu0 %v196_v51  ;;  %706 = vmatpush3.msra.mxu1 %v214_v49 }
  0x61   :  { %654 = vmatpush3.msra.mxu0 %v180_v53  ;;  %707 = vmatprep.subr.mxu1 %v213_v57 }
  0x62   :  { %302 = vmatmul.mubr.f32.gmra.mxu0 %v863_v48  ;;  %655 = vmatprep.subr.mxu0 %v195_v55  ;;  %v209_v48 = vld [vmem:[#allocation7 + $0x300] sm:$0xff] }
  0x63   :  { %376 = vmatprep.mubr.f32.mxu1 %v86_v58  ;;  %656 = vmatpush3.msra.mxu0 %v179_v59 }
  0x64   :  { %708 = vmatpush3.msra.mxu1 %v213_v57  ;;  %657 = vmatprep.subr.mxu0 %v194_v60 }
  0x65   :  { %377 = vmatmul.mubr.f32.gmra.mxu1 %v78_v56  ;;  %709 = vmatprep.subr.mxu1 %v212_v63 }
  0x66   :  { %658 = vmatpush3.msra.mxu0 %v178_v0  ;;  %710 = vmatpush3.msra.mxu1 %v212_v63 }
  0x67   :  { %659 = vmatprep.subr.mxu0 %v193_v3  ;;  %711 = vmatprep.subr.mxu1 %v211_v5 }
  0x68   :  { %660 = vmatpush3.msra.mxu0 %v177_v6  ;;  %446 = vmatprep.mubr.f32.mxu0 %v100_v9 }
  0x69   :  { %712 = vmatpush3.msra.mxu1 %v211_v5  ;;  %447 = vmatmul.mubr.f32.vlgmr.msra.gmra.mxu0 %v92_v10 }
  0x6a   :  { %713 = vmatprep.subr.mxu1 %v210_v11  ;;  %451 = vmatprep.mubr.f32.mxu0 %v102_v47 }
  0x6b   :  { %714 = vmatpush3.msra.mxu1 %v210_v11  ;;  %717 = vmatprep.mubr.f32.mxu1 %v108_v14 }
  0x6c   :  { %715 = vmatprep.subr.mxu1 %v209_v48 }
  0x6d   :  { %716 = vmatpush3.msra.mxu1 %v209_v48  ;;  %452 = vmatmul.mubr.f32.gmra.mxu0 %v94_v15 }
  0x6e   :  { %718 = vmatmul.mubr.f32.vlgmr.msra.gmra.mxu1 %v110_v16 }
 0x106   :  { %v585_v17 = vpop.f32.mrf.mxu0 }
 0x108   :  { %v586_v18 = vpop.f32.mrf.mxu0 }
 0x109   :  { %v623_v19 = vpop.f32.mrf.mxu1  ;;  %v587_v22 = vadd.f32 %v586_v18, %v585_v17 }
 0x10b   :  { %v624_v21 = vpop.f32.mrf.mxu1  ;;  %v299_v26 = vadd.f32 %v587_v22, %v552_v23 }
 0x10c   :  { %v625_v27 = vadd.f32 %v624_v21, %v623_v19 }
 0x10e   :  { %v374_v32 = vadd.f32 %v625_v27, %v299_v26 }
 0x122   :  { %v588_v20 = vpop.f32.mrf.mxu0 }
 0x124   :  { %v589_v24 = vpop.f32.mrf.mxu0 }
 0x125   :  { %v626_v25 = vpop.f32.mrf.mxu1  ;;  %v590_v28 = vadd.f32 %v589_v24, %v588_v20 }
 0x127   :  { %v627_v29 = vpop.f32.mrf.mxu1  ;;  %v304_v33 = vadd.f32 %v590_v28, %v552_v23 }
 0x128   :  { %v628_v34 = vadd.f32 %v627_v29, %v626_v25 }
 0x129   :  { %v661_v30 = vpop.f32.mrf.mxu0 }
 0x12a   :  { %v379_v41 = vadd.f32 %v628_v34, %v304_v33 }
 0x12b   :  { %v662_v31 = vpop.f32.mrf.mxu0 }
 0x12c   :  { %v663_v35 = vadd.f32 %v662_v31, %v661_v30 }
 0x12d   :  { %v664_v36 = vpop.f32.mrf.mxu0 }
 0x12e   :  { %v719_v37 = vpop.f32.mrf.mxu1  ;;  %v449_v38 = vadd.f32 %v663_v35, %v374_v32 }
 0x12f   :  { %v665_v39 = vpop.f32.mrf.mxu0 }
 0x130   :  { %v523_v40 = vpop.f32.mrf.mxu1  ;;  %v666_v42 = vadd.f32 %v665_v39, %v664_v36 }
 0x131   :  { %v524_v43 = vadd.f32 %v523_v40, %v449_v38 }
 0x132   :  { %v454_v44 = vadd.f32 %v666_v42, %v379_v41 }
 0x133   :  { %532 = vst [vmem:[#allocation8] sm:$0xff] %v524_v43 }
 0x134   :  { %v529_v45 = vadd.f32 %v719_v37, %v454_v44 }
 0x136   :  { %533 = vst [vmem:[#allocation8 + $0x8] sm:$0xff] %v529_v45 }
 0x137   :  { %797 = shalt.err (!%p794_p5)
}
 0x138   :  { %545 = dma.vmem_to_hbm [thread:$0]  %s540_s5, 256, %s924_s4, [#allocation4], %s814_s20, %s814_s20, %s815_s21  }
 0x139   :  { %810 = dma.done.wait [#allocation4], 256  }
 0x13a   :  { %811 = vsyncadd [#allocation4], 4294967040 }
 0x13b   :  { %549 = vsyncpa [#allocation3], 1 }
 0x13c   :  { %550 = vsyncpa [#allocation6], 1 }
 0x13d   :  { %551 = vsyncpa [#allocation4], 1 }

</bundles_post_ra>
